<compile_context>
chip_gen: v7x
topology: tpu7x:2x2x1
jax: 0.10.0
libtpu: 0.0.40
codegen_flags: <defaults>
</compile_context>

<pallas_src>
import functools
import math

import jax
import jax.numpy as jnp
from jax import lax
from jax.experimental import pallas as pl
from jax.experimental.pallas import tpu as pltpu

LANES = 128


def _focal_elementwise(p, t, alpha, gamma, hard_targets=False):
    """Elementwise focal loss, matching PyTorch F.binary_cross_entropy math."""
    p = p.astype(jnp.float32)
    t = t.astype(jnp.float32)
    # PyTorch F.binary_cross_entropy clamps the log terms at -100.
    log_p = jnp.maximum(jnp.log(p), -100.0)
    log_1mp = jnp.maximum(jnp.log(1.0 - p), -100.0)
    bce = -(t * log_p + (1.0 - t) * log_1mp)

    if hard_targets:
        # For {0,1} targets, pt == exp(-bce) except below exp(-100) (f32
        # subnormal range); saves one EUP transcendental per element (v7x).
        pt = jnp.where(t >= 0.5, p, 1.0 - p)
    else:
        pt = jnp.exp(-bce)

    g = float(gamma)
    if g == 2.0:
        w = jnp.square(1.0 - pt)            # VPU multiply, not EUP pow
    elif g == int(g):
        w = lax.integer_pow(1.0 - pt, int(g))
    else:
        w = (1.0 - pt) ** g                 # generic (soft) gamma fallback
    return float(alpha) * w * bce


def _focal_loss_kernel(p_ref, t_ref, out_ref, *, alpha, gamma, rows,
                       block_rows, steps_per_split, any_ragged, hard_targets):
    c = pl.program_id(0)            # TensorCore split axis ("parallel")
    i = pl.program_id(1)            # row-block reduction axis ("arbitrary")

    @pl.when(i == 0)
    def _():
        out_ref[...] = jnp.zeros_like(out_ref)

    focal = _focal_elementwise(p_ref[...], t_ref[...], alpha, gamma,
                               hard_targets)

    def accumulate(x):
        # Regroups whole (8, 128) tiles (no lane movement); pure-VPU adds
        # into the vreg-shaped resident accumulator.
        out_ref[...] += x.reshape(block_rows // 8, 8, LANES).sum(axis=0)

    if any_ragged:
        b = c * steps_per_split + i          # global (unclamped) block index
        valid = rows - b * block_rows        # rows of this block still valid

        @pl.when(valid >= block_rows)
        def _():
            accumulate(focal)                # full block: no mask cost

        @pl.when(valid < block_rows)
        def _():
            # Mask BEFORE the sum: out-of-range rows hold unspecified data.
            # Block-local int32 row indices -> no overflow for any size.
            row_idx = lax.broadcasted_iota(jnp.int32, focal.shape, 0)
            accumulate(jnp.where(row_idx < valid, focal, 0.0))
    else:
        accumulate(focal)


def _sublane_multiple(dtype):
    # Sub-32-bit dtypes pack along sublanes: second-minor block dim must be a
    # multiple of 8 * (4 / itemsize)  (f32 -> 8, bf16 -> 16, int8/bool -> 32).
    return 8 * max(1, 4 // jnp.dtype(dtype).itemsize)


def focal_loss(preds, targets, alpha=0.25, gamma=2, block_rows=4096,
               hard_targets=False):
    """Pallas TPU implementation of FocalLoss.forward (returns a scalar)."""
    assert preds.shape == targets.shape
    n_total = math.prod(preds.shape) if preds.shape else 1

    flat_p = preds.reshape(-1)      # contiguous reshape: no copy
    flat_t = targets.reshape(-1)

    rows = n_total // LANES
    tail = n_total - rows * LANES

    if tail:
        # <128-element ragged remainder: negligible, computed in plain JAX.
        tail_sum = jnp.sum(_focal_elementwise(
            flat_p[rows * LANES:], flat_t[rows * LANES:], alpha, gamma,
            hard_targets))
    else:
        tail_sum = jnp.float32(0.0)

    if rows == 0:
        return tail_sum / jnp.float32(n_total)

    if tail:
        # TODO(synk): a non-identity slice feeding a custom call makes XLA
        # materialize a near-full copy of both inputs; allow_input_fusion
        # (below) asks XLA to fuse the slice into the kernel input instead.
        p2 = flat_p[:rows * LANES].reshape(rows, LANES)
        t2 = flat_t[:rows * LANES].reshape(rows, LANES)
    else:
        p2 = flat_p.reshape(rows, LANES)    # identity reshape: no copy
        t2 = flat_t.reshape(rows, LANES)

    # Row-block size: a multiple of both dtypes' sublane packing, at least one
    # packing unit, no larger than needed.  4096 f32 rows = 2 MiB/block.
    mult = max(_sublane_multiple(preds.dtype), _sublane_multiple(targets.dtype))
    block_rows = max(
        mult,
        (min(int(block_rows), pl.cdiv(rows, mult) * mult) // mult) * mult)

    n_blocks = pl.cdiv(rows, block_rows)
    # Leading "parallel" axis: splits the row range across the 2 TensorCores
    # on v7x; on 1-TC chips (v5e/v6e) it is just an outer sequential loop.
    n_splits = 2 if n_blocks >= 2 else 1
    steps_per_split = pl.cdiv(n_blocks, n_splits)
    # Masking needed if the last real block is partial or phantom blocks exist.
    any_ragged = (rows % block_rows != 0) or (n_splits * steps_per_split
                                              != n_blocks)

    last_block = n_blocks - 1

    def in_index_map(c, i):
        # Clamp phantom blocks (past the end of the row range) onto the last
        # real block; their contribution is fully masked in-kernel.
        return (jnp.minimum(c * steps_per_split + i, last_block), 0)

    kernel = functools.partial(
        _focal_loss_kernel,
        alpha=float(alpha),
        gamma=gamma,
        rows=rows,
        block_rows=block_rows,
        steps_per_split=steps_per_split,
        any_ragged=any_ragged,
        hard_targets=hard_targets,
    )

    n_bulk = rows * LANES
    cost = pl.CostEstimate(
        flops=14 * n_bulk,
        transcendentals=(2 if hard_targets else 3) * n_bulk,
        bytes_accessed=n_bulk * (p2.dtype.itemsize + t2.dtype.itemsize)
        + n_splits * 8 * LANES * 4,
    )

    partial = pl.pallas_call(
        kernel,
        out_shape=jax.ShapeDtypeStruct((n_splits, 8, LANES), jnp.float32),
        grid_spec=pltpu.PrefetchScalarGridSpec(
            num_scalar_prefetch=0,
            grid=(n_splits, steps_per_split),
            in_specs=[
                pl.BlockSpec((block_rows, LANES), in_index_map),
                pl.BlockSpec((block_rows, LANES), in_index_map),
            ],
            out_specs=pl.BlockSpec((None, 8, LANES), lambda c, i: (c, 0, 0)),
        ),
        compiler_params=pltpu.CompilerParams(
            dimension_semantics=("parallel", "arbitrary"),
            vmem_limit_bytes=32 * 1024 * 1024,
            allow_input_fusion=[True, True] if tail else None,
        ),
        cost_estimate=cost,
    )(p2, t2)

    # One tiny cross-lane reduce + divide over <= 2 KiB of partial sums.
    # (f32 partial sums may drift ~1e-7 relative for 1e8+ elements; fine for
    # a scalar loss.)
    return (jnp.sum(partial) + tail_sum) / jnp.float32(n_total)


if __name__ == "__main__":
    key = jax.random.PRNGKey(0)
    kp, kt = jax.random.split(key)

    # Small NCHW-shaped inputs; preds are probabilities, targets in {0, 1}.
    shape = (2, 4, 16, 16)
    preds = jax.random.uniform(kp, shape, dtype=jnp.float32,
                               minval=1e-4, maxval=1.0 - 1e-4)
    targets = (jax.random.uniform(kt, shape, dtype=jnp.float32) > 0.5
               ).astype(jnp.float32)

    loss = focal_loss(preds, targets, alpha=0.25, gamma=2)
    jax.block_until_ready(loss)

    # Pure-JAX reference (same math as the PyTorch module).
    log_p = jnp.maximum(jnp.log(preds), -100.0)
    log_1mp = jnp.maximum(jnp.log(1.0 - preds), -100.0)
    bce = -(targets * log_p + (1.0 - targets) * log_1mp)
    pt = jnp.exp(-bce)
    ref = jnp.mean(0.25 * (1.0 - pt) ** 2 * bce)
    assert jnp.allclose(loss, ref, rtol=1e-5, atol=1e-6), (loss, ref)

    # Also exercise the reduced-EUP hard-target path (identical for {0,1}).
    loss_fast = focal_loss(preds, targets, alpha=0.25, gamma=2,
                           hard_targets=True)
    jax.block_until_ready(loss_fast)
    assert jnp.allclose(loss_fast, ref, rtol=1e-5, atol=1e-6), (loss_fast, ref)

    print("KERNEL_OK")
</pallas_src>

<mosaic_0001>
module attributes {stable_mosaic.version = 11 : i64} {
  func.func @_focal_loss_kernel(%arg0: i32, %arg1: i32, %arg2: memref<16x128xf32, #tpu.memory_space<vmem>>, %arg3: memref<16x128xf32, #tpu.memory_space<vmem>>, %arg4: memref<1x8x128xf32, #tpu.memory_space<vmem>>) attributes {dimension_semantics = [#tpu.dimension_semantics<parallel>, #tpu.dimension_semantics<arbitrary>], iteration_bounds = array<i64: 1, 1>, scalar_prefetch = 0 : i64, scratch_operands = 0 : i64, tpu.core_type = #tpu.core_type<tc>, window_params = [{transform_indices = @transform_0, window_bounds = array<i64: 16, 128>}, {transform_indices = @transform_1, window_bounds = array<i64: 16, 128>}, {transform_indices = @transform_2, window_bounds = array<i64: 1, 8, 128>}]} {
    %c0_i32 = arith.constant 0 : i32
    %0 = arith.cmpi eq, %arg1, %c0_i32 : i32
    %1 = arith.extui %0 : i1 to i32
    %c0_i32_0 = arith.constant 0 : i32
    %2 = arith.cmpi ne, %1, %c0_i32_0 : i32
    scf.if %2 {
      %cst_18 = arith.constant 0.000000e+00 : f32
      %37 = vector.broadcast %cst_18 : f32 to vector<8x128xf32>
      %c0_19 = arith.constant 0 : index
      %c0_20 = arith.constant 0 : index
      %c0_21 = arith.constant 0 : index
      %38 = vector.load %arg4[%c0_19, %c0_20, %c0_21] : memref<1x8x128xf32, #tpu.memory_space<vmem>>, vector<1x8x128xf32>
      %39 = vector.shape_cast %38 : vector<1x8x128xf32> to vector<8x128xf32>
      %40 = vector.shape_cast %37 : vector<8x128xf32> to vector<1x8x128xf32>
      tpu.vector_store %arg4[%c0_19, %c0_20, %c0_21], %40 {strides = array<i32>} : memref<1x8x128xf32, #tpu.memory_space<vmem>>, vector<1x8x128xf32>,
    } else {
    }
    %c0 = arith.constant 0 : index
    %c0_1 = arith.constant 0 : index
    %3 = vector.load %arg2[%c0, %c0_1] : memref<16x128xf32, #tpu.memory_space<vmem>>, vector<16x128xf32>
    %c0_2 = arith.constant 0 : index
    %c0_3 = arith.constant 0 : index
    %4 = vector.load %arg3[%c0_2, %c0_3] : memref<16x128xf32, #tpu.memory_space<vmem>>, vector<16x128xf32>
    %5 = math.log %3 : vector<16x128xf32>
    %cst = arith.constant -1.000000e+02 : f32
    %6 = vector.broadcast %cst : f32 to vector<16x128xf32>
    %7 = arith.maximumf %5, %6 : vector<16x128xf32>
    %cst_4 = arith.constant 1.000000e+00 : f32
    %8 = vector.broadcast %cst_4 : f32 to vector<16x128xf32>
    %9 = arith.subf %8, %3 : vector<16x128xf32>
    %10 = math.log %9 : vector<16x128xf32>
    %cst_5 = arith.constant -1.000000e+02 : f32
    %11 = vector.broadcast %cst_5 : f32 to vector<16x128xf32>
    %12 = arith.maximumf %10, %11 : vector<16x128xf32>
    %13 = arith.mulf %4, %7 : vector<16x128xf32>
    %cst_6 = arith.constant 1.000000e+00 : f32
    %14 = vector.broadcast %cst_6 : f32 to vector<16x128xf32>
    %15 = arith.subf %14, %4 : vector<16x128xf32>
    %16 = arith.mulf %15, %12 : vector<16x128xf32>
    %17 = arith.addf %13, %16 : vector<16x128xf32>
    %cst_7 = arith.constant 0.000000e+00 : f32
    %18 = vector.broadcast %cst_7 : f32 to vector<16x128xf32>
    %19 = arith.subf %18, %17 : vector<16x128xf32>
    %cst_8 = arith.constant 0.000000e+00 : f32
    %20 = vector.broadcast %cst_8 : f32 to vector<16x128xf32>
    %21 = arith.subf %20, %19 : vector<16x128xf32>
    %22 = math.exp %21 : vector<16x128xf32>
    %cst_9 = arith.constant 1.000000e+00 : f32
    %23 = vector.broadcast %cst_9 : f32 to vector<16x128xf32>
    %24 = arith.subf %23, %22 : vector<16x128xf32>
    %25 = arith.mulf %24, %24 : vector<16x128xf32>
    %cst_10 = arith.constant 2.500000e-01 : f32
    %26 = vector.broadcast %cst_10 : f32 to vector<16x128xf32>
    %27 = arith.mulf %26, %25 : vector<16x128xf32>
    %28 = arith.mulf %27, %19 : vector<16x128xf32>
    %c0_11 = arith.constant 0 : index
    %c0_12 = arith.constant 0 : index
    %c0_13 = arith.constant 0 : index
    %29 = vector.load %arg4[%c0_11, %c0_12, %c0_13] : memref<1x8x128xf32, #tpu.memory_space<vmem>>, vector<1x8x128xf32>
    %30 = vector.shape_cast %29 : vector<1x8x128xf32> to vector<8x128xf32>
    %31 = vector.shape_cast %28 : vector<16x128xf32> to vector<2x8x128xf32>
    %cst_14 = arith.constant dense<0.000000e+00> : vector<8x128xf32>
    %32 = vector.multi_reduction <add>, %31, %cst_14 [0] : vector<2x8x128xf32> to vector<8x128xf32>
    %33 = arith.addf %30, %32 : vector<8x128xf32>
    %c0_15 = arith.constant 0 : index
    %c0_16 = arith.constant 0 : index
    %c0_17 = arith.constant 0 : index
    %34 = vector.load %arg4[%c0_15, %c0_16, %c0_17] : memref<1x8x128xf32, #tpu.memory_space<vmem>>, vector<1x8x128xf32>
    %35 = vector.shape_cast %34 : vector<1x8x128xf32> to vector<8x128xf32>
    %36 = vector.shape_cast %33 : vector<8x128xf32> to vector<1x8x128xf32>
    tpu.vector_store %arg4[%c0_15, %c0_16, %c0_17], %36 {strides = array<i32>} : memref<1x8x128xf32, #tpu.memory_space<vmem>>, vector<1x8x128xf32>,
    return
  }
  func.func @transform_0(%arg0: i32, %arg1: i32) -> (i32, i32) {
    %c1_i32 = arith.constant 1 : i32
    %0 = arith.muli %arg0, %c1_i32 : i32
    %1 = arith.addi %0, %arg1 : i32
    %c0_i32 = arith.constant 0 : i32
    %2 = arith.minsi %1, %c0_i32 : i32
    %c0_i32_0 = arith.constant 0 : i32
    %c0_i32_1 = arith.constant 0 : i32
    return %2, %c0_i32_0 : i32, i32
  }
  func.func @transform_1(%arg0: i32, %arg1: i32) -> (i32, i32) {
    %c1_i32 = arith.constant 1 : i32
    %0 = arith.muli %arg0, %c1_i32 : i32
    %1 = arith.addi %0, %arg1 : i32
    %c0_i32 = arith.constant 0 : i32
    %2 = arith.minsi %1, %c0_i32 : i32
    %c0_i32_0 = arith.constant 0 : i32
    %c0_i32_1 = arith.constant 0 : i32
    return %2, %c0_i32_0 : i32, i32
  }
  func.func @transform_2(%arg0: i32, %arg1: i32) -> (i32, i32, i32) {
    %c0_i32 = arith.constant 0 : i32
    %c0_i32_0 = arith.constant 0 : i32
    %c0_i32_1 = arith.constant 0 : i32
    return %arg0, %c0_i32, %c0_i32_0 : i32, i32, i32
  }
}

</mosaic_0001>

<bundles_post_ra>
// kernel: tpu_custom_call.1
= control target key start
LH: loop header
LB: loop body
LE: loop exit
PB: predicated region body
PF: predicated region fallthrough
CT: control target
= control target key end

     0   :  { %7 = vsyncpa [#allocation3], 0  ;;  %s277_s0 = inlined_call_operand.hbm [shape: f32[16,128], index: 0, kind: input, shape index: {}]   ;;  %s278_s1 = inlined_call_operand.hbm [shape: f32[16,128], index: 1, kind: input, shape index: {}]   ;;  %s279_s2 = inlined_call_operand.hbm [shape: f32[1,8,128], index: 2, kind: output, shape index: {}]  }
   0x1   :  { %8 = vsyncpa [#allocation6], 0 }
   0x2   :  { %9 = vsyncpa [#allocation4], 0  ;;  %s221_s9 = smov [#allocation2]   ;;  %s149_s13 = scalar_lea.hbm %s277_s0, 256 }
   0x3   :  { %s21_s10 = sshll.u32 %s221_s9, 4  ;;  %p150_p0 = scmp.ne.s32.totalorder %s277_s0, %s149_s13  ;;  %s22_s10 = int_to_ptr.vmem [resolvable:$true] %s21_s10 }
   0x4   :  { %p153_p1 = scmp.lt.u32.totalorder %s149_s13, %s277_s0 }
   0x6   :  { %p155_p2 = pnand %p153_p1, %p150_p0 }
   0x8   :  { %158 = shalt.err (!%p155_p2)
}
   0x9   :  { %s159_s18 = scalar_lea.vmem %s22_s10, 256  ;;  %p164_p4 = scmp.lt.s32.totalorder %s22_s10, %s22_s10 }
   0xa   :  { %p160_p3 = scmp.ne.s32.totalorder %s22_s10, %s159_s18  ;;  %p165_p5 = scmp.lt.s32.totalorder %s159_s18, %s159_s18 }
   0xc   :  { %p166_p6 = por %p165_p5, %p164_p4 }
   0xe   :  { %p167_p7 = pnand %p166_p6, %p160_p3 }
  0x10   :  { %170 = shalt.err (!%p167_p7)
}
  0x11   :  { %s222_s19 = smov 128   ;;  %s223_s20 = smov 8  }
  0x12   :  { %27 = dma.hbm_to_vmem [thread:$0]  %s277_s0, 256, %s22_s10, [#allocation3], %s222_s19, %s222_s19, %s223_s20  }
  0x13   :  { %s224_s23 = smov [#allocation5]   ;;  %s171_s27 = scalar_lea.hbm %s278_s1, 256 }
  0x14   :  { %s39_s24 = sshll.u32 %s224_s23, 4  ;;  %p172_p8 = scmp.ne.s32.totalorder %s278_s1, %s171_s27  ;;  %s40_s24 = int_to_ptr.vmem [resolvable:$true] %s39_s24 }
  0x15   :  { %p175_p9 = scmp.lt.u32.totalorder %s171_s27, %s278_s1 }
  0x17   :  { %p177_p10 = pnand %p175_p9, %p172_p8 }
  0x19   :  { %180 = shalt.err (!%p177_p10)
}
  0x1a   :  { %s181_s4 = scalar_lea.vmem %s40_s24, 256  ;;  %p186_p12 = scmp.lt.s32.totalorder %s40_s24, %s40_s24 }
  0x1b   :  { %p182_p11 = scmp.ne.s32.totalorder %s40_s24, %s181_s4  ;;  %p187_p13 = scmp.lt.s32.totalorder %s181_s4, %s181_s4 }
  0x1d   :  { %p188_p0 = por %p187_p13, %p186_p12 }
  0x1f   :  { %p189_p1 = pnand %p188_p0, %p182_p11 }
  0x21   :  { %192 = shalt.err (!%p189_p1)
}
  0x22   :  { %45 = dma.hbm_to_vmem [thread:$0]  %s278_s1, 256, %s40_s24, [#allocation6], %s222_s19, %s222_s19, %s223_s20  }
  0x23   :  { %215 = dma.done.wait [#allocation3], 256  }
  0x24   :  { %216 = vsyncadd [#allocation3], 4294967040 }
  0x25   :  { %217 = dma.done.wait [#allocation6], 256  }
  0x26   :  { %218 = vsyncadd [#allocation6], 4294967040  ;;  %v65_v0 = vld [vmem:[#allocation2] sm:$0xff]  ;;  %v66_v1 = vld [vmem:[#allocation2 + $0x8] sm:$0xff]  ;;  %s225_s1 = smov [#allocation7]  }
  0x27   :  { %137 = vlog2.f32 %v65_v0  ;;  %v75_v2 = vsub.f32 1.0, %v65_v0  ;;  %v76_v3 = vsub.f32 1.0, %v66_v1  ;;  %v67_v5 = vld [vmem:[#allocation5] sm:$0xff]  ;;  %v68_v7 = vld [vmem:[#allocation5 + $0x8] sm:$0xff]  ;;  %s117_s6 = sshll.u32 %s225_s1, 4  ;;  %s118_s6 = int_to_ptr.vmem [resolvable:$true] %s117_s6 }
  0x28   :  { %139 = vlog2.f32 %v66_v1  ;;  %v85_v14 = vsub.f32 1.0, %v67_v5  ;;  %v86_v17 = vsub.f32 1.0, %v68_v7  ;;  %s193_s7 = scalar_lea.vmem %s118_s6, 128  ;;  %p198_p3 = scmp.lt.s32.totalorder %s118_s6, %s118_s6 }
  0x29   :  { %141 = vlog2.f32 %v75_v2  ;;  %p194_p2 = scmp.ne.s32.totalorder %s118_s6, %s193_s7  ;;  %p199_p4 = scmp.lt.s32.totalorder %s193_s7, %s193_s7 }
  0x2a   :  { %143 = vlog2.f32 %v76_v3 }
  0x2b   :  { %p200_p5 = por %p199_p4, %p198_p3 }
  0x2d   :  { %p201_p6 = pnand %p200_p5, %p194_p2 }
  0x31   :  { %v138_v4 = vpop.eup %137 }
  0x32   :  { %v140_v6 = vpop.eup %139  ;;  %v70_v8 = vmul.f32 0.6931472, %v138_v4 }
  0x33   :  { %v142_v9 = vpop.eup %141  ;;  %v72_v10 = vmul.f32 0.6931472, %v140_v6 }
  0x34   :  { %v144_v11 = vpop.eup %143  ;;  %v73_v12 = vmax.f32 %v70_v8, -100.0  ;;  %v78_v13 = vmul.f32 0.6931472, %v142_v9 }
  0x35   :  { %v74_v15 = vmax.f32 %v72_v10, -100.0  ;;  %v80_v16 = vmul.f32 0.6931472, %v144_v11 }
  0x36   :  { %v81_v18 = vmax.f32 %v78_v13, -100.0  ;;  %v83_v19 = vmul.f32 %v73_v12, %v67_v5 }
  0x37   :  { %v82_v20 = vmax.f32 %v80_v16, -100.0  ;;  %v84_v21 = vmul.f32 %v74_v15, %v68_v7 }
  0x38   :  { %v87_v22 = vmul.f32 %v85_v14, %v81_v18 }
  0x39   :  { %v88_v23 = vmul.f32 %v86_v17, %v82_v20 }
  0x3a   :  { %v89_v24 = vadd.f32 %v87_v22, %v83_v19 }
  0x3b   :  { %v90_v25 = vadd.f32 %v88_v23, %v84_v21 }
  0x3c   :  { %v91_v26 = vsub.f32 0.0, %v89_v24 }
  0x3d   :  { %v92_v27 = vsub.f32 0.0, %v90_v25 }
  0x3e   :  { %v93_v28 = vsub.f32 0.0, %v91_v26 }
  0x3f   :  { %v94_v29 = vsub.f32 0.0, %v92_v27 }
  0x40   :  { %v95_v30 = vmul.f32 1.442695, %v93_v28 }
  0x41   :  { %v97_v31 = vmul.f32 1.442695, %v94_v29 }
  0x42   :  { %145 = vpow2.f32 %v95_v30 }
  0x43   :  { %147 = vpow2.f32 %v97_v31 }
  0x4c   :  { %v146_v32 = vpop.eup %145 }
  0x4d   :  { %v148_v33 = vpop.eup %147  ;;  %v99_v34 = vsub.f32 1.0, %v146_v32 }
  0x4e   :  { %v100_v35 = vsub.f32 1.0, %v148_v33 }
  0x4f   :  { %v101_v36 = vmul.f32 %v99_v34, %v99_v34 }
  0x50   :  { %v102_v37 = vmul.f32 %v100_v35, %v100_v35 }
  0x51   :  { %v103_v38 = vmul.f32 0.25, %v101_v36 }
  0x52   :  { %v104_v39 = vmul.f32 0.25, %v102_v37 }
  0x53   :  { %v105_v40 = vmul.f32 %v103_v38, %v91_v26 }
  0x54   :  { %v106_v41 = vmul.f32 %v104_v39, %v92_v27 }
  0x56   :  { %v108_v42 = vadd.f32 %v106_v41, %v105_v40 }
  0x58   :  { %110 = vst [vmem:[#allocation7] sm:$0xff] %v108_v42 }
  0x59   :  { %204 = shalt.err (!%p201_p6)
}
  0x5a   :  { %s205_s10 = scalar_lea.hbm %s279_s2, 128 }
  0x5b   :  { %p206_p7 = scmp.ne.s32.totalorder %s279_s2, %s205_s10  ;;  %p209_p8 = scmp.lt.u32.totalorder %s205_s10, %s279_s2 }
  0x5d   :  { %p211_p9 = pnand %p209_p8, %p206_p7 }
  0x5f   :  { %214 = shalt.err (!%p211_p9)
}
  0x60   :  { %120 = dma.vmem_to_hbm [thread:$0]  %s118_s6, 128, %s279_s2, [#allocation4]  }
  0x61   :  { %219 = dma.done.wait [#allocation4], 128  }
  0x62   :  { %220 = vsyncadd [#allocation4], 4294967168 }
  0x63   :  { %124 = vsyncpa [#allocation3], 1 }
  0x64   :  { %125 = vsyncpa [#allocation6], 1 }
  0x65   :  { %126 = vsyncpa [#allocation4], 1 }

</bundles_post_ra>
